<compile_context>
chip_gen: v7x
topology: tpu7x:2x2x1
jax: 0.10.0
libtpu: 0.0.40
codegen_flags: <defaults>
</compile_context>

<pallas_src>
import jax
import jax.numpy as jnp
from jax.experimental import pallas as pl
from jax.experimental.pallas import tpu as pltpu

EPS = 1e-5
TOPO_EMBEDDING_WEIGHT = 2.0
NEG_BIG = -1e30          # padding value for unused logit lanes
VEC_ROWS = 16            # packed small-parameter array rows (multiple of 8)


def compute_topological_features(x):
    # TODO(synk): gudhi RipsComplex / H1 persistence-diagram extraction is a
    # combinatorial CPU algorithm with no Pallas equivalent; we use the
    # module's documented empty-persistence fallback (feature = [0.0]).
    del x
    return jnp.zeros((1, 1), jnp.float32)


# ----------------------------------------------------------------------------
# Fused HOINetwork forward kernel:
#   3x (HypergraphConv -> BatchNorm1d [-> ReLU]) + topology embedding + MLP
#   head + log_softmax, all VMEM-resident (shapes are small).
# ----------------------------------------------------------------------------
def _hoin_kernel(x_ref, h_ref, dinv_ref, binv_ref,
                 w1_ref, w2_ref, w3_ref,
                 wf1a_ref, wf1b_ref, wf2_ref,
                 vec_ref, out_ref):
    H = h_ref[...]                       # (N, E) bf16 (0/1 incidence, exact)
    dinv = dinv_ref[...]                 # (N, 1) f32   1/deg(node),      inf -> 0
    binv = binv_ref[...]                 # (E, 1) f32   1/deg(hyperedge), inf -> 0
    vec = vec_ref[...]                   # (16, 128) f32 packed small params

    # Packed-row layout (see _pack_small_params in the wrapper).
    b1, g1, be1 = vec[0:1, 0:64], vec[1:2, 0:64], vec[2:3, 0:64]
    b2, g2, be2 = vec[3:4, :],    vec[4:5, :],    vec[5:6, :]
    b3, g3, be3 = vec[6:7, 0:64], vec[7:8, 0:64], vec[8:9, 0:64]
    wt, bt = vec[9:10, 0:64], vec[10:11, 0:64]
    bf1 = vec[11:12, :]
    bf2 = vec[12:13, :]                  # lanes C: are -1e30 (softmax padding)
    topo = vec[13:14, 0:1]               # (1, 1)

    def hconv(x, w, b):
        # D^-1 H B^-1 H^T (X Theta) + bias
        xt = jnp.dot(x, w, preferred_element_type=jnp.float32)          # (N, out)
        # H^T @ xt via a transposed contraction (no materialized H.T).
        msg = jax.lax.dot_general(
            H, xt.astype(jnp.bfloat16),
            (((0,), (0,)), ((), ())),
            preferred_element_type=jnp.float32)                          # (E, out)
        msg = msg * binv
        o = jnp.dot(H, msg.astype(jnp.bfloat16),
                    preferred_element_type=jnp.float32) * dinv           # (N, out)
        return o + b

    def bn(x, g, be):
        # BatchNorm1d training-mode forward, single-pass batch statistics
        # (biased variance, eps = 1e-5).
        inv_n = 1.0 / x.shape[0]
        mu = jnp.sum(x, axis=0, keepdims=True) * inv_n
        ex2 = jnp.sum(x * x, axis=0, keepdims=True) * inv_n
        var = ex2 - mu * mu
        return (x - mu) * jax.lax.rsqrt(var + EPS) * g + be

    x = x_ref[...]
    h1 = jnp.maximum(bn(hconv(x, w1_ref[...], b1), g1, be1), 0.0)
    h2 = jnp.maximum(bn(hconv(h1, w2_ref[...], b2), g2, be2), 0.0)
    h3 = bn(hconv(h2, w3_ref[...], b3), g3, be3)

    # topology embedding: relu(Linear(1, 64)(topo_scalar)) * 2.0
    temb = jnp.maximum(topo * wt + bt, 0.0) * TOPO_EMBEDDING_WEIGHT      # (1, 64)

    # cat([h3, repeat(temb)], dim=1) @ Wf1 + bf1
    #   == h3 @ Wf1[:64] + temb @ Wf1[64:] + bf1   (avoids in-kernel concat;
    #   the (1,128) topo term broadcasts across rows == torch repeat)
    f1 = jnp.dot(h3, wf1a_ref[...], preferred_element_type=jnp.float32)
    f1 = f1 + jnp.dot(temb, wf1b_ref[...], preferred_element_type=jnp.float32)
    f1 = jnp.maximum(f1 + bf1, 0.0)

    # fc2 (weight zero-padded to 128 lanes, bias padded with -1e30 so the
    # padded lanes vanish from the softmax) + log_softmax over dim=1.
    logits = (jnp.dot(f1, wf2_ref[...], preferred_element_type=jnp.float32)
              + bf2)
    m = jnp.max(logits, axis=1, keepdims=True)
    lse = m + jnp.log(jnp.sum(jnp.exp(logits - m), axis=1, keepdims=True))
    out_ref[...] = logits - lse


def _pack_row(v, fill=0.0, width=128):
    v = jnp.reshape(v, (1, -1)).astype(jnp.float32)
    return jnp.pad(v, ((0, 0), (0, width - v.shape[1])), constant_values=fill)


def _pack_small_params(params, topo_scalar):
    rows = [
        _pack_row(params["b1"]), _pack_row(params["g1"]), _pack_row(params["be1"]),
        _pack_row(params["b2"]), _pack_row(params["g2"]), _pack_row(params["be2"]),
        _pack_row(params["b3"]), _pack_row(params["g3"]), _pack_row(params["be3"]),
        _pack_row(params["wt"]), _pack_row(params["bt"]),
        _pack_row(params["bf1"]),
        _pack_row(params["bf2"], fill=NEG_BIG),
        _pack_row(topo_scalar),
    ]
    vec = jnp.concatenate(rows, axis=0)
    return jnp.pad(vec, ((0, VEC_ROWS - vec.shape[0]), (0, 0)))


def hoin_forward(x, H, params, topo_scalar):
    n = x.shape[0]
    c = params["wf2"].shape[1]

    # Node / hyperedge degrees -> normalizers (kept f32 for exact 1/deg).
    deg_n = jnp.sum(H, axis=1, keepdims=True)            # (N, 1)
    deg_e = jnp.sum(H, axis=0)[:, None]                  # (E, 1), no transpose
    dinv = jnp.where(deg_n > 0, 1.0 / deg_n, 0.0)
    binv = jnp.where(deg_e > 0, 1.0 / deg_e, 0.0)

    H_bf16 = H.astype(jnp.bfloat16)                      # exact for 0/1 incidence

    # fc2 weight zero-padded to 128 output lanes (lane-dense output stores).
    wf2p = jnp.pad(params["wf2"].astype(jnp.float32), ((0, 0), (0, 128 - c)))

    vec = _pack_small_params(params, topo_scalar)

    args = [x.astype(jnp.float32), H_bf16, dinv, binv,
            params["w1"], params["w2"], params["w3"],
            params["wf1a"], params["wf1b"], wf2p, vec]

    out_full = pl.pallas_call(
        _hoin_kernel,
        out_shape=jax.ShapeDtypeStruct((n, 128), jnp.float32),
        in_specs=[pl.BlockSpec(memory_space=pltpu.MemorySpace.VMEM)] * len(args),
        out_specs=pl.BlockSpec(memory_space=pltpu.MemorySpace.VMEM),
    )(*args)
    return out_full[:, :c]


# ----------------------------------------------------------------------------
# Deterministic parameter init (shapes from HOINetwork.__init__).
# ----------------------------------------------------------------------------
def init_params(key, num_features, num_classes):
    ks = jax.random.split(key, 9)

    def lin(k, fan_in, fan_out):
        return (jax.random.normal(k, (fan_in, fan_out), jnp.float32)
                * (1.0 / jnp.sqrt(jnp.float32(fan_in))))

    p = {}
    # HypergraphConv 1/2/3 (Theta + bias) and their BatchNorm1d params
    p["w1"] = lin(ks[0], num_features, 64)
    p["b1"] = jnp.zeros((1, 64), jnp.float32)
    p["g1"] = jnp.ones((1, 64), jnp.float32)
    p["be1"] = jnp.zeros((1, 64), jnp.float32)

    p["w2"] = lin(ks[1], 64, 128)
    p["b2"] = jnp.zeros((1, 128), jnp.float32)
    p["g2"] = jnp.ones((1, 128), jnp.float32)
    p["be2"] = jnp.zeros((1, 128), jnp.float32)

    p["w3"] = lin(ks[2], 128, 64)
    p["b3"] = jnp.zeros((1, 64), jnp.float32)
    p["g3"] = jnp.ones((1, 64), jnp.float32)
    p["be3"] = jnp.zeros((1, 64), jnp.float32)

    # topology_fc: Linear(1, 64)
    p["wt"] = lin(ks[3], 1, 64)
    p["bt"] = jax.random.normal(ks[4], (1, 64), jnp.float32) * 0.1

    # fc1: Linear(128, 128), split along its input dim (graph half / topo half)
    wf1 = lin(ks[5], 128, 128)
    p["wf1a"] = wf1[:64]
    p["wf1b"] = wf1[64:]
    p["bf1"] = jax.random.normal(ks[6], (1, 128), jnp.float32) * 0.1

    # fc2: Linear(128, num_classes)
    p["wf2"] = lin(ks[7], 128, num_classes)
    p["bf2"] = jax.random.normal(ks[8], (1, num_classes), jnp.float32) * 0.1
    return p


if __name__ == "__main__":
    key = jax.random.PRNGKey(0)
    N, F, E, C = 16, 8, 8, 4          # nodes, features, hyperedges, classes
    kx, kp = jax.random.split(key)

    # Node features (data.x)
    x = jax.random.normal(kx, (N, F), jnp.float32)

    # Deterministic hypergraph (edge_index -> dense incidence H [N, E]):
    # node n belongs to hyperedges (n % E) and ((3n + 1) % E).
    nodes = jnp.arange(N)
    H = jnp.zeros((N, E), jnp.float32)
    H = H.at[nodes, nodes % E].set(1.0)
    H = H.at[nodes, (3 * nodes + 1) % E].set(1.0)

    params = init_params(kp, F, C)

    # Topology branch: gudhi persistence is untranslatable -> documented
    # empty-H1 fallback ([0.0]); no dead pairwise-distance kernel is launched.
    topo = compute_topological_features(x)

    out = jax.jit(hoin_forward)(x, H, params, topo)
    jax.block_until_ready(out)

    assert out.shape == (N, C)
    assert bool(jnp.all(jnp.isfinite(out)))
    # log_softmax rows must exponentiate to ~1
    assert bool(jnp.allclose(jnp.sum(jnp.exp(out), axis=1), 1.0, atol=1e-4))
    print("KERNEL_OK")
</pallas_src>

<mosaic_0001>
module attributes {stable_mosaic.version = 11 : i64} {
  func.func @_hoin_kernel(%arg0: memref<16x8xf32, #tpu.memory_space<vmem>>, %arg1: memref<16x8xbf16, #tpu.memory_space<vmem>>, %arg2: memref<16x1xf32, #tpu.memory_space<vmem>>, %arg3: memref<8x1xf32, #tpu.memory_space<vmem>>, %arg4: memref<8x64xf32, #tpu.memory_space<vmem>>, %arg5: memref<64x128xf32, #tpu.memory_space<vmem>>, %arg6: memref<128x64xf32, #tpu.memory_space<vmem>>, %arg7: memref<64x128xf32, #tpu.memory_space<vmem>>, %arg8: memref<64x128xf32, #tpu.memory_space<vmem>>, %arg9: memref<128x128xf32, #tpu.memory_space<vmem>>, %arg10: memref<16x128xf32, #tpu.memory_space<vmem>>, %arg11: memref<16x128xf32, #tpu.memory_space<vmem>>) attributes {dimension_semantics = [], scalar_prefetch = 0 : i64, scratch_operands = 0 : i64, tpu.core_type = #tpu.core_type<tc>} {
    %c0 = arith.constant 0 : index
    %c0_0 = arith.constant 0 : index
    %0 = vector.load %arg1[%c0, %c0_0] : memref<16x8xbf16, #tpu.memory_space<vmem>>, vector<16x8xbf16>
    %c0_1 = arith.constant 0 : index
    %c0_2 = arith.constant 0 : index
    %1 = vector.load %arg2[%c0_1, %c0_2] : memref<16x1xf32, #tpu.memory_space<vmem>>, vector<16x1xf32>
    %c0_3 = arith.constant 0 : index
    %c0_4 = arith.constant 0 : index
    %2 = vector.load %arg3[%c0_3, %c0_4] : memref<8x1xf32, #tpu.memory_space<vmem>>, vector<8x1xf32>
    %c0_5 = arith.constant 0 : index
    %c0_6 = arith.constant 0 : index
    %3 = vector.load %arg10[%c0_5, %c0_6] : memref<16x128xf32, #tpu.memory_space<vmem>>, vector<16x128xf32>
    %4 = vector.extract_strided_slice %3 {offsets = [0, 0], sizes = [1, 64], strides = [1, 1]} : vector<16x128xf32> to vector<1x64xf32>
    %5 = vector.extract_strided_slice %3 {offsets = [1, 0], sizes = [1, 64], strides = [1, 1]} : vector<16x128xf32> to vector<1x64xf32>
    %6 = vector.extract_strided_slice %3 {offsets = [2, 0], sizes = [1, 64], strides = [1, 1]} : vector<16x128xf32> to vector<1x64xf32>
    %7 = vector.extract_strided_slice %3 {offsets = [3, 0], sizes = [1, 128], strides = [1, 1]} : vector<16x128xf32> to vector<1x128xf32>
    %8 = vector.extract_strided_slice %3 {offsets = [4, 0], sizes = [1, 128], strides = [1, 1]} : vector<16x128xf32> to vector<1x128xf32>
    %9 = vector.extract_strided_slice %3 {offsets = [5, 0], sizes = [1, 128], strides = [1, 1]} : vector<16x128xf32> to vector<1x128xf32>
    %10 = vector.extract_strided_slice %3 {offsets = [6, 0], sizes = [1, 64], strides = [1, 1]} : vector<16x128xf32> to vector<1x64xf32>
    %11 = vector.extract_strided_slice %3 {offsets = [7, 0], sizes = [1, 64], strides = [1, 1]} : vector<16x128xf32> to vector<1x64xf32>
    %12 = vector.extract_strided_slice %3 {offsets = [8, 0], sizes = [1, 64], strides = [1, 1]} : vector<16x128xf32> to vector<1x64xf32>
    %13 = vector.extract_strided_slice %3 {offsets = [9, 0], sizes = [1, 64], strides = [1, 1]} : vector<16x128xf32> to vector<1x64xf32>
    %14 = vector.extract_strided_slice %3 {offsets = [10, 0], sizes = [1, 64], strides = [1, 1]} : vector<16x128xf32> to vector<1x64xf32>
    %15 = vector.extract_strided_slice %3 {offsets = [11, 0], sizes = [1, 128], strides = [1, 1]} : vector<16x128xf32> to vector<1x128xf32>
    %16 = vector.extract_strided_slice %3 {offsets = [12, 0], sizes = [1, 128], strides = [1, 1]} : vector<16x128xf32> to vector<1x128xf32>
    %17 = vector.extract_strided_slice %3 {offsets = [13, 0], sizes = [1, 1], strides = [1, 1]} : vector<16x128xf32> to vector<1x1xf32>
    %c0_7 = arith.constant 0 : index
    %c0_8 = arith.constant 0 : index
    %18 = vector.load %arg0[%c0_7, %c0_8] : memref<16x8xf32, #tpu.memory_space<vmem>>, vector<16x8xf32>
    %c0_9 = arith.constant 0 : index
    %c0_10 = arith.constant 0 : index
    %19 = vector.load %arg4[%c0_9, %c0_10] : memref<8x64xf32, #tpu.memory_space<vmem>>, vector<8x64xf32>
    %cst = arith.constant dense<0.000000e+00> : vector<16x64xf32>
    %20 = tpu.matmul %18, %19, %cst {dimension_numbers = #tpu.dot_dimension_numbers<[1], [0], [0], [1], [0, 0, 1, 1], [], []>} : vector<16x8xf32>, vector<8x64xf32>, vector<16x64xf32> -> vector<16x64xf32>
    %21 = arith.truncf %20 : vector<16x64xf32> to vector<16x64xbf16>
    %cst_11 = arith.constant dense<0.000000e+00> : vector<8x64xf32>
    %22 = tpu.matmul %0, %21, %cst_11 {dimension_numbers = #tpu.dot_dimension_numbers<[0], [0], [1], [1], [0, 1, 1, 1], [], []>} : vector<16x8xbf16>, vector<16x64xbf16>, vector<8x64xf32> -> vector<8x64xf32>
    %23 = vector.broadcast %2 : vector<8x1xf32> to vector<8x64xf32>
    %24 = arith.mulf %22, %23 : vector<8x64xf32>
    %25 = arith.truncf %24 : vector<8x64xf32> to vector<8x64xbf16>
    %cst_12 = arith.constant dense<0.000000e+00> : vector<16x64xf32>
    %26 = tpu.matmul %0, %25, %cst_12 {dimension_numbers = #tpu.dot_dimension_numbers<[1], [0], [0], [1], [0, 0, 1, 1], [], []>} : vector<16x8xbf16>, vector<8x64xbf16>, vector<16x64xf32> -> vector<16x64xf32>
    %27 = vector.broadcast %1 : vector<16x1xf32> to vector<16x64xf32>
    %28 = arith.mulf %26, %27 : vector<16x64xf32>
    %29 = vector.broadcast %4 : vector<1x64xf32> to vector<16x64xf32>
    %30 = arith.addf %28, %29 : vector<16x64xf32>
    %cst_13 = arith.constant dense<0.000000e+00> : vector<64xf32>
    %31 = vector.multi_reduction <add>, %30, %cst_13 [0] : vector<16x64xf32> to vector<64xf32>
    %32 = vector.shape_cast %31 : vector<64xf32> to vector<1x64xf32>
    %cst_14 = arith.constant 6.250000e-02 : f32
    %33 = vector.broadcast %cst_14 : f32 to vector<1x64xf32>
    %34 = arith.mulf %32, %33 : vector<1x64xf32>
    %35 = arith.mulf %30, %30 : vector<16x64xf32>
    %cst_15 = arith.constant dense<0.000000e+00> : vector<64xf32>
    %36 = vector.multi_reduction <add>, %35, %cst_15 [0] : vector<16x64xf32> to vector<64xf32>
    %37 = vector.shape_cast %36 : vector<64xf32> to vector<1x64xf32>
    %cst_16 = arith.constant 6.250000e-02 : f32
    %38 = vector.broadcast %cst_16 : f32 to vector<1x64xf32>
    %39 = arith.mulf %37, %38 : vector<1x64xf32>
    %40 = arith.mulf %34, %34 : vector<1x64xf32>
    %41 = arith.subf %39, %40 : vector<1x64xf32>
    %42 = vector.broadcast %34 : vector<1x64xf32> to vector<16x64xf32>
    %43 = arith.subf %30, %42 : vector<16x64xf32>
    %cst_17 = arith.constant 9.99999974E-6 : f32
    %44 = vector.broadcast %cst_17 : f32 to vector<1x64xf32>
    %45 = arith.addf %41, %44 : vector<1x64xf32>
    %46 = math.rsqrt %45 : vector<1x64xf32>
    %47 = vector.broadcast %46 : vector<1x64xf32> to vector<16x64xf32>
    %48 = arith.mulf %43, %47 : vector<16x64xf32>
    %49 = vector.broadcast %5 : vector<1x64xf32> to vector<16x64xf32>
    %50 = arith.mulf %48, %49 : vector<16x64xf32>
    %51 = vector.broadcast %6 : vector<1x64xf32> to vector<16x64xf32>
    %52 = arith.addf %50, %51 : vector<16x64xf32>
    %cst_18 = arith.constant 0.000000e+00 : f32
    %53 = vector.broadcast %cst_18 : f32 to vector<16x64xf32>
    %54 = arith.maximumf %52, %53 : vector<16x64xf32>
    %c0_19 = arith.constant 0 : index
    %c0_20 = arith.constant 0 : index
    %55 = vector.load %arg5[%c0_19, %c0_20] : memref<64x128xf32, #tpu.memory_space<vmem>>, vector<64x128xf32>
    %cst_21 = arith.constant dense<0.000000e+00> : vector<16x128xf32>
    %56 = tpu.matmul %54, %55, %cst_21 {dimension_numbers = #tpu.dot_dimension_numbers<[1], [0], [0], [1], [0, 0, 1, 1], [], []>} : vector<16x64xf32>, vector<64x128xf32>, vector<16x128xf32> -> vector<16x128xf32>
    %57 = arith.truncf %56 : vector<16x128xf32> to vector<16x128xbf16>
    %cst_22 = arith.constant dense<0.000000e+00> : vector<8x128xf32>
    %58 = tpu.matmul %0, %57, %cst_22 {dimension_numbers = #tpu.dot_dimension_numbers<[0], [0], [1], [1], [0, 1, 1, 1], [], []>} : vector<16x8xbf16>, vector<16x128xbf16>, vector<8x128xf32> -> vector<8x128xf32>
    %59 = vector.broadcast %2 : vector<8x1xf32> to vector<8x128xf32>
    %60 = arith.mulf %58, %59 : vector<8x128xf32>
    %61 = arith.truncf %60 : vector<8x128xf32> to vector<8x128xbf16>
    %cst_23 = arith.constant dense<0.000000e+00> : vector<16x128xf32>
    %62 = tpu.matmul %0, %61, %cst_23 {dimension_numbers = #tpu.dot_dimension_numbers<[1], [0], [0], [1], [0, 0, 1, 1], [], []>} : vector<16x8xbf16>, vector<8x128xbf16>, vector<16x128xf32> -> vector<16x128xf32>
    %63 = vector.broadcast %1 : vector<16x1xf32> to vector<16x128xf32>
    %64 = arith.mulf %62, %63 : vector<16x128xf32>
    %65 = vector.broadcast %7 : vector<1x128xf32> to vector<16x128xf32>
    %66 = arith.addf %64, %65 : vector<16x128xf32>
    %cst_24 = arith.constant dense<0.000000e+00> : vector<128xf32>
    %67 = vector.multi_reduction <add>, %66, %cst_24 [0] : vector<16x128xf32> to vector<128xf32>
    %68 = vector.shape_cast %67 : vector<128xf32> to vector<1x128xf32>
    %cst_25 = arith.constant 6.250000e-02 : f32
    %69 = vector.broadcast %cst_25 : f32 to vector<1x128xf32>
    %70 = arith.mulf %68, %69 : vector<1x128xf32>
    %71 = arith.mulf %66, %66 : vector<16x128xf32>
    %cst_26 = arith.constant dense<0.000000e+00> : vector<128xf32>
    %72 = vector.multi_reduction <add>, %71, %cst_26 [0] : vector<16x128xf32> to vector<128xf32>
    %73 = vector.shape_cast %72 : vector<128xf32> to vector<1x128xf32>
    %cst_27 = arith.constant 6.250000e-02 : f32
    %74 = vector.broadcast %cst_27 : f32 to vector<1x128xf32>
    %75 = arith.mulf %73, %74 : vector<1x128xf32>
    %76 = arith.mulf %70, %70 : vector<1x128xf32>
    %77 = arith.subf %75, %76 : vector<1x128xf32>
    %78 = vector.broadcast %70 : vector<1x128xf32> to vector<16x128xf32>
    %79 = arith.subf %66, %78 : vector<16x128xf32>
    %cst_28 = arith.constant 9.99999974E-6 : f32
    %80 = vector.broadcast %cst_28 : f32 to vector<1x128xf32>
    %81 = arith.addf %77, %80 : vector<1x128xf32>
    %82 = math.rsqrt %81 : vector<1x128xf32>
    %83 = vector.broadcast %82 : vector<1x128xf32> to vector<16x128xf32>
    %84 = arith.mulf %79, %83 : vector<16x128xf32>
    %85 = vector.broadcast %8 : vector<1x128xf32> to vector<16x128xf32>
    %86 = arith.mulf %84, %85 : vector<16x128xf32>
    %87 = vector.broadcast %9 : vector<1x128xf32> to vector<16x128xf32>
    %88 = arith.addf %86, %87 : vector<16x128xf32>
    %cst_29 = arith.constant 0.000000e+00 : f32
    %89 = vector.broadcast %cst_29 : f32 to vector<16x128xf32>
    %90 = arith.maximumf %88, %89 : vector<16x128xf32>
    %c0_30 = arith.constant 0 : index
    %c0_31 = arith.constant 0 : index
    %91 = vector.load %arg6[%c0_30, %c0_31] : memref<128x64xf32, #tpu.memory_space<vmem>>, vector<128x64xf32>
    %cst_32 = arith.constant dense<0.000000e+00> : vector<16x64xf32>
    %92 = tpu.matmul %90, %91, %cst_32 {dimension_numbers = #tpu.dot_dimension_numbers<[1], [0], [0], [1], [0, 0, 1, 1], [], []>} : vector<16x128xf32>, vector<128x64xf32>, vector<16x64xf32> -> vector<16x64xf32>
    %93 = arith.truncf %92 : vector<16x64xf32> to vector<16x64xbf16>
    %cst_33 = arith.constant dense<0.000000e+00> : vector<8x64xf32>
    %94 = tpu.matmul %0, %93, %cst_33 {dimension_numbers = #tpu.dot_dimension_numbers<[0], [0], [1], [1], [0, 1, 1, 1], [], []>} : vector<16x8xbf16>, vector<16x64xbf16>, vector<8x64xf32> -> vector<8x64xf32>
    %95 = vector.broadcast %2 : vector<8x1xf32> to vector<8x64xf32>
    %96 = arith.mulf %94, %95 : vector<8x64xf32>
    %97 = arith.truncf %96 : vector<8x64xf32> to vector<8x64xbf16>
    %cst_34 = arith.constant dense<0.000000e+00> : vector<16x64xf32>
    %98 = tpu.matmul %0, %97, %cst_34 {dimension_numbers = #tpu.dot_dimension_numbers<[1], [0], [0], [1], [0, 0, 1, 1], [], []>} : vector<16x8xbf16>, vector<8x64xbf16>, vector<16x64xf32> -> vector<16x64xf32>
    %99 = vector.broadcast %1 : vector<16x1xf32> to vector<16x64xf32>
    %100 = arith.mulf %98, %99 : vector<16x64xf32>
    %101 = vector.broadcast %10 : vector<1x64xf32> to vector<16x64xf32>
    %102 = arith.addf %100, %101 : vector<16x64xf32>
    %cst_35 = arith.constant dense<0.000000e+00> : vector<64xf32>
    %103 = vector.multi_reduction <add>, %102, %cst_35 [0] : vector<16x64xf32> to vector<64xf32>
    %104 = vector.shape_cast %103 : vector<64xf32> to vector<1x64xf32>
    %cst_36 = arith.constant 6.250000e-02 : f32
    %105 = vector.broadcast %cst_36 : f32 to vector<1x64xf32>
    %106 = arith.mulf %104, %105 : vector<1x64xf32>
    %107 = arith.mulf %102, %102 : vector<16x64xf32>
    %cst_37 = arith.constant dense<0.000000e+00> : vector<64xf32>
    %108 = vector.multi_reduction <add>, %107, %cst_37 [0] : vector<16x64xf32> to vector<64xf32>
    %109 = vector.shape_cast %108 : vector<64xf32> to vector<1x64xf32>
    %cst_38 = arith.constant 6.250000e-02 : f32
    %110 = vector.broadcast %cst_38 : f32 to vector<1x64xf32>
    %111 = arith.mulf %109, %110 : vector<1x64xf32>
    %112 = arith.mulf %106, %106 : vector<1x64xf32>
    %113 = arith.subf %111, %112 : vector<1x64xf32>
    %114 = vector.broadcast %106 : vector<1x64xf32> to vector<16x64xf32>
    %115 = arith.subf %102, %114 : vector<16x64xf32>
    %cst_39 = arith.constant 9.99999974E-6 : f32
    %116 = vector.broadcast %cst_39 : f32 to vector<1x64xf32>
    %117 = arith.addf %113, %116 : vector<1x64xf32>
    %118 = math.rsqrt %117 : vector<1x64xf32>
    %119 = vector.broadcast %118 : vector<1x64xf32> to vector<16x64xf32>
    %120 = arith.mulf %115, %119 : vector<16x64xf32>
    %121 = vector.broadcast %11 : vector<1x64xf32> to vector<16x64xf32>
    %122 = arith.mulf %120, %121 : vector<16x64xf32>
    %123 = vector.broadcast %12 : vector<1x64xf32> to vector<16x64xf32>
    %124 = arith.addf %122, %123 : vector<16x64xf32>
    %125 = vector.broadcast %17 : vector<1x1xf32> to vector<1x64xf32>
    %126 = arith.mulf %125, %13 : vector<1x64xf32>
    %127 = arith.addf %126, %14 : vector<1x64xf32>
    %cst_40 = arith.constant 0.000000e+00 : f32
    %128 = vector.broadcast %cst_40 : f32 to vector<1x64xf32>
    %129 = arith.maximumf %127, %128 : vector<1x64xf32>
    %cst_41 = arith.constant 2.000000e+00 : f32
    %130 = vector.broadcast %cst_41 : f32 to vector<1x64xf32>
    %131 = arith.mulf %129, %130 : vector<1x64xf32>
    %c0_42 = arith.constant 0 : index
    %c0_43 = arith.constant 0 : index
    %132 = vector.load %arg7[%c0_42, %c0_43] : memref<64x128xf32, #tpu.memory_space<vmem>>, vector<64x128xf32>
    %cst_44 = arith.constant dense<0.000000e+00> : vector<16x128xf32>
    %133 = tpu.matmul %124, %132, %cst_44 {dimension_numbers = #tpu.dot_dimension_numbers<[1], [0], [0], [1], [0, 0, 1, 1], [], []>} : vector<16x64xf32>, vector<64x128xf32>, vector<16x128xf32> -> vector<16x128xf32>
    %c0_45 = arith.constant 0 : index
    %c0_46 = arith.constant 0 : index
    %134 = vector.load %arg8[%c0_45, %c0_46] : memref<64x128xf32, #tpu.memory_space<vmem>>, vector<64x128xf32>
    %cst_47 = arith.constant dense<0.000000e+00> : vector<1x128xf32>
    %135 = tpu.matmul %131, %134, %cst_47 {dimension_numbers = #tpu.dot_dimension_numbers<[1], [0], [0], [1], [0, 0, 1, 1], [], []>} : vector<1x64xf32>, vector<64x128xf32>, vector<1x128xf32> -> vector<1x128xf32>
    %136 = vector.broadcast %135 : vector<1x128xf32> to vector<16x128xf32>
    %137 = arith.addf %133, %136 : vector<16x128xf32>
    %138 = vector.broadcast %15 : vector<1x128xf32> to vector<16x128xf32>
    %139 = arith.addf %137, %138 : vector<16x128xf32>
    %cst_48 = arith.constant 0.000000e+00 : f32
    %140 = vector.broadcast %cst_48 : f32 to vector<16x128xf32>
    %141 = arith.maximumf %139, %140 : vector<16x128xf32>
    %c0_49 = arith.constant 0 : index
    %c0_50 = arith.constant 0 : index
    %142 = vector.load %arg9[%c0_49, %c0_50] : memref<128x128xf32, #tpu.memory_space<vmem>>, vector<128x128xf32>
    %cst_51 = arith.constant dense<0.000000e+00> : vector<16x128xf32>
    %143 = tpu.matmul %141, %142, %cst_51 {dimension_numbers = #tpu.dot_dimension_numbers<[1], [0], [0], [1], [0, 0, 1, 1], [], []>} : vector<16x128xf32>, vector<128x128xf32>, vector<16x128xf32> -> vector<16x128xf32>
    %144 = vector.broadcast %16 : vector<1x128xf32> to vector<16x128xf32>
    %145 = arith.addf %143, %144 : vector<16x128xf32>
    %cst_52 = arith.constant dense<0xFF800000> : vector<16xf32>
    %146 = vector.multi_reduction <maximumf>, %145, %cst_52 [1] : vector<16x128xf32> to vector<16xf32>
    %147 = vector.shape_cast %146 : vector<16xf32> to vector<16x1xf32>
    %148 = vector.broadcast %147 : vector<16x1xf32> to vector<16x128xf32>
    %149 = arith.subf %145, %148 : vector<16x128xf32>
    %150 = math.exp %149 : vector<16x128xf32>
    %cst_53 = arith.constant dense<0.000000e+00> : vector<16xf32>
    %151 = vector.multi_reduction <add>, %150, %cst_53 [1] : vector<16x128xf32> to vector<16xf32>
    %152 = vector.shape_cast %151 : vector<16xf32> to vector<16x1xf32>
    %153 = math.log %152 : vector<16x1xf32>
    %154 = arith.addf %147, %153 : vector<16x1xf32>
    %155 = vector.broadcast %154 : vector<16x1xf32> to vector<16x128xf32>
    %156 = arith.subf %145, %155 : vector<16x128xf32>
    %c0_54 = arith.constant 0 : index
    %c0_55 = arith.constant 0 : index
    %157 = vector.load %arg11[%c0_54, %c0_55] : memref<16x128xf32, #tpu.memory_space<vmem>>, vector<16x128xf32>
    tpu.vector_store %arg11[%c0_54, %c0_55], %156 {strides = array<i32>} : memref<16x128xf32, #tpu.memory_space<vmem>>, vector<16x128xf32>,
    return
  }
}

</mosaic_0001>

<bundles_post_ra>
// kernel: hoin_forward.1
= control target key start
LH: loop header
LB: loop body
LE: loop exit
PB: predicated region body
PF: predicated region fallthrough
CT: control target
= control target key end

     0   :  { %vm49_vm0 = vcmask 64512   ;;  %v1478_v4 = vmov 0.0   ;;  %vm1479_vm1 = vmmov 0   ;;  %v1480_v5 = vmov 0   ;;  %s1854_s4 = inlined_call_operand.vmem [shape: f32[8,64], index: 4, kind: input, shape index: {}]   ;;  %s1855_s0 = inlined_call_operand.vmem [shape: f32[16,8], index: 0, kind: input, shape index: {}]   ;;  %s1856_s1 = inlined_call_operand.vmem [shape: bf16[16,8], index: 1, kind: input, shape index: {}]   ;;  %s1857_s3 = inlined_call_operand.vmem [shape: f32[8,1], index: 3, kind: input, shape index: {}]   ;;  %s1858_s2 = inlined_call_operand.vmem [shape: f32[16,1], index: 2, kind: input, shape index: {}]   ;;  %s1859_s10 = inlined_call_operand.vmem [shape: f32[16,128], index: 10, kind: input, shape index: {}]   ;;  %s1860_s5 = inlined_call_operand.vmem [shape: f32[64,128], index: 5, kind: input, shape index: {}]   ;;  %s1861_s6 = inlined_call_operand.vmem [shape: f32[128,64], index: 6, kind: input, shape index: {}]   ;;  %s1862_s8 = inlined_call_operand.vmem [shape: f32[64,128], index: 8, kind: input, shape index: {}]   ;;  %s1863_s7 = inlined_call_operand.vmem [shape: f32[64,128], index: 7, kind: input, shape index: {}]   ;;  %s1864_s9 = inlined_call_operand.vmem [shape: f32[128,128], index: 9, kind: input, shape index: {}]   ;;  %s1865_s11 = inlined_call_operand.vmem [shape: f32[16,128], index: 11, kind: output, shape index: {}]  }
   0x1   :  { %v48_v0 = vld [vmem:[%s1854_s4] sm:$0xff]  ;;  %v47_v2 = vld [vmem:[%s1855_s0 + $0x8] sm:$0xff]  ;;  %1186 = vmatprep.subr.bf16.mxu1 %v1478_v4  ;;  %1188 = vmatprep.mubr.msk.bf16.mxu1 %vm1479_vm1, %v1478_v4  ;;  %vm154_vm2 = vcmask 130048   ;;  %vm208_vm3 = vcmask 1043456   ;;  %v318_v25 = vld [vmem:[%s1860_s5 + $0x10] sm:$0xff]  ;;  %v265_v34 = vlaneseq  ;;  %vm271_vm4 = vcmask 523264  }
   0x2   :  { %v46_v1 = vld [vmem:[%s1855_s0] sm:$0xff]  ;;  %1181 = vmatprep.subr.mxu0 %v48_v0  ;;  %1462 = vset.pattern.permute.xlu1 %v1480_v5  ;;  %v42_v12 = vld [vmem:[%s1858_s2 + $0x8] sm:$0xff]  ;;  %v319_v26 = vld [vmem:[%s1860_s5 + $0x18] sm:$0xff] }
   0x3   :  { %1183 = vmatprep.mubr.msk.f32.mxu0 %vm49_vm0, %v46_v1  ;;  %v1555_v3 = vld [vmem:[%s1856_s1] sm:$0xff]   ;;  %1182 = vmatpush3.msra.mxu0 %v48_v0  ;;  %v1584_v13 = vld [vmem:[%s1859_s10 + $0x8] sm:$0xff]  ;;  %v1353_v27 = vpack.c.bf16 %v319_v26, %v318_v25  ;;  %v322_v31 = vld [vmem:[%s1860_s5 + $0x30] sm:$0xff]  ;;  %v1617_v35 = vshrl.u32 %v265_v34, 7 }
   0x4   :  { %1184 = vmatmul.mubr.msk.f32.vlgmr.msra.gmra.mrb[0].mxu0 %vm49_vm0, %v47_v2  ;;  %138 = vxpose.xlu0.c.b16.start.end [1/1] (short) (narrow) %v1555_v3, 16  ;;  %v43_v6 = vld [vmem:[%s1857_s3] sm:$0xff]  ;;  %v317_v23 = vld [vmem:[%s1860_s5 + $0x8] sm:$0xff]  ;;  %v323_v32 = vld [vmem:[%s1860_s5 + $0x38] sm:$0xff] }
   0x5   :  { %1217 = vmatprep.subr.bf16.mxu0 %v1478_v4  ;;  %1219 = vmatprep.mubr.msk.bf16.mxu0 %vm1479_vm1, %v1478_v4  ;;  %v41_v11 = vld [vmem:[%s1858_s2] sm:$0xff]  ;;  %v321_v29 = vld [vmem:[%s1860_s5 + $0x28] sm:$0xff]  ;;  %v1361_v33 = vpack.c.bf16 %v323_v32, %v322_v31  ;;  %v1620_v36 = vsub.s32 0, %v1617_v35 }
   0x6   :  { %255 = vperm.xlu1 %1462, %v41_v11   ;;  %v316_v22 = vld [vmem:[%s1860_s5] sm:$0xff] }
   0x7   :  { %v1349_v24 = vpack.c.bf16 %v317_v23, %v316_v22  ;;  %v320_v28 = vld [vmem:[%s1860_s5 + $0x20] sm:$0xff] }
   0x8   :  { %v1357_v30 = vpack.c.bf16 %v321_v29, %v320_v28  ;;  %v1625_v37 = vld [vmem:[%s1859_s10] sm:$0xff] }
   0x9   :  { %v268_v39 = vrot.slane %v1625_v37, %v1620_v36 }
   0xa   :  { %260 = vperm.xlu1 %1462, %v42_v12  }
   0xd   :  { %1461 = vset.pattern.permute.xlu0 %v1480_v5 }
   0xe   :  { %200 = vperm.xlu0 %1461, %v43_v6   ;;  %770 = vperm.xlu1 %1462, %v1584_v13  }
  0x6a   :  { %v1568_v10 = vpop.trf.xlu0 }
  0x85   :  { %v1627_v38 = vpop.permute.xlu1 %255 }
  0x89   :  { %v1632_v43 = vpop.permute.xlu1 %260 }
  0x8d   :  { %v1587_v14 = vpop.permute.xlu0 %200 }
  0xd7   :  { %v1185_v7 = vpop.f32.mrb[0].mxu0 }
  0xd8   :  { %v122_v8 = vpop.f32.mrb[1].mxu0 }
  0xd9   :  { %v131_v9 = vpack.c.bf16 %v1185_v7, %v122_v8 }
  0xdb   :  { %1187 = vmatpush3.bf16.msra.mxu1 %v131_v9 }
  0xdc   :  { %1192 = vmatprep.subr.bf16.mxu1 %v1478_v4 }
  0xde   :  { %1189 = vmatmul.mubr.msk.bf16.vlgmr.msra.gmra.mrb[0].mxu1 %vm154_vm2, %v1568_v10 }
  0xdf   :  { %1194 = vmatprep.mubr.msk.bf16.mxu1 %vm1479_vm1, %v1478_v4 }
 0x1b1   :  { %v192_v15 = vpop.f32.mrb[0].mxu1 }
 0x1b2   :  { %v203_v16 = vmul.f32 %v1587_v14, %v192_v15  ;;  %v1190_v17 = vpop.f32.mrb[1].mxu1 }
 0x1b3   :  { %v195_v18 = vpop.f32.mrb[2].mxu1  ;;  %v304_v17 = vsub.s32 1, %v1617_v35 }
 0x1b4   :  { %v204_v19 = vpack.c.bf16 %v203_v16, %v203_v16  ;;  %v1191_v20 = vpop.f32.mrb[3].mxu1  ;;  %v310_v18 = vsub.s32 2, %v1617_v35 }
 0x1b6   :  { %v210_v21 = vsel %vm208_vm3, %v204_v19, 0  ;;  %v305_v19 = vrot.slane %v1625_v37, %v304_v17  ;;  %v311_v23 = vrot.slane %v1625_v37, %v310_v18 }
 0x1b7   :  { %1193 = vmatpush3.bf16.msra.mxu1 %v210_v21 }
 0x1b8   :  { %1350 = vmatprep.subr.bf16.mxu1 %v1349_v24 }
 0x1ba   :  { %1195 = vmatmul.mubr.msk.bf16.vlgmr.msra.gmra.mrb[4].mxu1 %vm49_vm0, %v1555_v3 }
 0x1bb   :  { %1352 = vmatpush3.bf16.msra.mxu1 %v1349_v24 }
 0x1bc   :  { %1354 = vmatprep.subr.bf16.mxu1 %v1353_v27 }
 0x1bf   :  { %1356 = vmatpush3.bf16.msra.mxu1 %v1353_v27 }
 0x1c0   :  { %1358 = vmatprep.subr.bf16.mxu1 %v1357_v30 }
 0x1c3   :  { %1360 = vmatpush3.bf16.msra.mxu1 %v1357_v30 }
 0x1c4   :  { %1362 = vmatprep.subr.bf16.mxu1 %v1361_v33 }
 0x1c7   :  { %1364 = vmatpush3.bf16.msra.mxu1 %v1361_v33 }
 0x28d   :  { %v246_v40 = vpop.f32.mrb[4].mxu1 }
 0x28e   :  { %v263_v41 = vmul.f32 %v1627_v38, %v246_v40  ;;  %v1196_v42 = vpop.f32.mrb[5].mxu1 }
 0x28f   :  { %v249_v44 = vpop.f32.mrb[6].mxu1 }
 0x290   :  { %v269_v45 = vadd.f32 %v268_v39, %v263_v41  ;;  %v264_v46 = vmul.f32 %v1632_v43, %v249_v44  ;;  %v1197_v47 = vpop.f32.mrb[7].mxu1 }
 0x292   :  { %v282_v48 = vmul.f32 %v269_v45, %v269_v45  ;;  %v270_v49 = vadd.f32 %v268_v39, %v264_v46  ;;  %v272_v50 = vsel %vm271_vm4, %v269_v45, 0.0  ;;  %v541_v46 = vld [vmem:[%s1861_s6 + $0x8] sm:$0xff] }
 0x294   :  { %v273_v51 = vsel %vm271_vm4, %v270_v49, 0.0  ;;  %v283_v52 = vmul.f32 %v270_v49, %v270_v49  ;;  %v284_v54 = vsel %vm271_vm4, %v282_v48, 0.0  ;;  %v542_v48 = vld [vmem:[%s1861_s6 + $0x10] sm:$0xff] }
 0x295   :  { %v274_v53 = vadd.f32 %v273_v51, %v272_v50  ;;  %v544_v51 = vld [vmem:[%s1861_s6 + $0x20] sm:$0xff] }
 0x296   :  { %v285_v55 = vsel %vm271_vm4, %v283_v52, 0.0  ;;  %v545_v52 = vld [vmem:[%s1861_s6 + $0x28] sm:$0xff] }
 0x297   :  { %v275_v56 = vrot.slane %v274_v53, 4  ;;  %v286_v57 = vadd.f32 %v285_v55, %v284_v54  ;;  %v546_v54 = vld [vmem:[%s1861_s6 + $0x30] sm:$0xff]  ;;  %v547_v55 = vld [vmem:[%s1861_s6 + $0x38] sm:$0xff] }
 0x299   :  { %v276_v58 = vadd.f32 %v275_v56, %v274_v53  ;;  %v287_v59 = vrot.slane %v286_v57, 4  ;;  %v1373_v53 = vpack.c.bf16 %v545_v52, %v544_v51  ;;  %v1377_v56 = vpack.c.bf16 %v547_v55, %v546_v54 }
 0x29b   :  { %v277_v60 = vrot.slane %v276_v58, 2  ;;  %v288_v61 = vadd.f32 %v287_v59, %v286_v57  ;;  %v548_v57 = vld [vmem:[%s1861_s6 + $0x40] sm:$0xff] }
 0x29d   :  { %v278_v62 = vadd.f32 %v277_v60, %v276_v58  ;;  %v289_v63 = vrot.slane %v288_v61, 2  ;;  %v549_v58 = vld [vmem:[%s1861_s6 + $0x48] sm:$0xff]  ;;  %v550_v60 = vld [vmem:[%s1861_s6 + $0x50] sm:$0xff] }
 0x29e   :  { %v1381_v59 = vpack.c.bf16 %v549_v58, %v548_v57 }
 0x29f   :  { %v279_v0 = vrot.slane %v278_v62, 1  ;;  %v290_v1 = vadd.f32 %v289_v63, %v288_v61  ;;  %v551_v61 = vld [vmem:[%s1861_s6 + $0x58] sm:$0xff]  ;;  %v552_v63 = vld [vmem:[%s1861_s6 + $0x60] sm:$0xff] }
 0x2a1   :  { %v280_v2 = vadd.f32 %v279_v0, %v278_v62  ;;  %v291_v5 = vrot.slane %v290_v1, 1  ;;  %v1385_v62 = vpack.c.bf16 %v551_v61, %v550_v60  ;;  %v553_v0 = vld [vmem:[%s1861_s6 + $0x68] sm:$0xff] }
 0x2a3   :  { %v281_v6 = vmul.f32 0.0625, %v280_v2  ;;  %v292_v7 = vadd.f32 %v291_v5, %v290_v1  ;;  %v1389_v1 = vpack.c.bf16 %v553_v0, %v552_v63  ;;  %v554_v2 = vld [vmem:[%s1861_s6 + $0x70] sm:$0xff]  ;;  %v555_v5 = vld [vmem:[%s1861_s6 + $0x78] sm:$0xff] }
 0x2a5   :  { %v293_v8 = vmul.f32 0.0625, %v292_v7  ;;  %v294_v9 = vmul.f32 %v281_v6, %v281_v6  ;;  %v297_v11 = vsub.f32 %v270_v49, %v281_v6  ;;  %v296_v12 = vsub.f32 %v269_v45, %v281_v6  ;;  %v540_v45 = vld [vmem:[%s1861_s6] sm:$0xff]  ;;  %v543_v49 = vld [vmem:[%s1861_s6 + $0x18] sm:$0xff] }
 0x2a6   :  { %v1365_v47 = vpack.c.bf16 %v541_v46, %v540_v45  ;;  %v1369_v50 = vpack.c.bf16 %v543_v49, %v542_v48  ;;  %v1393_v6 = vpack.c.bf16 %v555_v5, %v554_v2  ;;  %v496_v7 = vsub.s32 3, %v1617_v35 }
 0x2a7   :  { %v295_v15 = vsub.f32 %v293_v8, %v294_v9  ;;  %v528_v48 = vsub.s32 4, %v1617_v35  ;;  %v534_v49 = vsub.s32 5, %v1617_v35 }
 0x2a8   :  { %1366 = vmatprep.subr.bf16.mxu1 %v1365_v47  ;;  %v497_v8 = vrot.slane %v1625_v37, %v496_v7 }
 0x2a9   :  { %v298_v16 = vadd.f32 1e-05, %v295_v15  ;;  %v535_v54 = vrot.slane %v1625_v37, %v534_v49  ;;  %v965_v49 = vld [vmem:[%s1864_s9 + $0x8] sm:$0xff] }
 0x2ab   :  { %1464 = vrsqrt.f32 %v298_v16 }
 0x2b5   :  { %v1465_v20 = vpop.eup %1464 }
 0x2b6   :  { %v301_v21 = vmul.f32 %v1465_v20, %v297_v11  ;;  %v300_v22 = vmul.f32 %v1465_v20, %v296_v12 }
 0x2b8   :  { %v307_v24 = vmul.f32 %v305_v19, %v301_v21  ;;  %v306_v25 = vmul.f32 %v305_v19, %v300_v22 }
 0x2ba   :  { %v312_v26 = vadd.f32 %v311_v23, %v306_v25  ;;  %v313_v27 = vadd.f32 %v311_v23, %v307_v24 }
 0x2bc   :  { %v314_v28 = vmax.f32 %v312_v26, 0.0  ;;  %v315_v29 = vmax.f32 %v313_v27, 0.0 }
 0x2be   :  { %1214 = vmatprep.mubr.msk.f32.mxu1 %vm271_vm4, %v314_v28 }
 0x2bf   :  { %1215 = vmatmul.mubr.msk.f32.vlgmr.msra.gmra.mrb[8].mxu1 %vm271_vm4, %v315_v29 }
 0x2c0   :  { %1368 = vmatpush3.bf16.msra.mxu1 %v1365_v47 }
 0x2c1   :  { %1370 = vmatprep.subr.bf16.mxu1 %v1369_v50 }
 0x2c4   :  { %1372 = vmatpush3.bf16.msra.mxu1 %v1369_v50  ;;  %v529_v50 = vrot.slane %v1625_v37, %v528_v48 }
 0x2c5   :  { %1374 = vmatprep.subr.bf16.mxu1 %v1373_v53 }
 0x2c8   :  { %1376 = vmatpush3.bf16.msra.mxu1 %v1373_v53 }
 0x2c9   :  { %1378 = vmatprep.subr.bf16.mxu1 %v1377_v56 }
 0x2cc   :  { %1380 = vmatpush3.bf16.msra.mxu1 %v1377_v56 }
 0x2cd   :  { %1382 = vmatprep.subr.bf16.mxu1 %v1381_v59 }
 0x2d0   :  { %1384 = vmatpush3.bf16.msra.mxu1 %v1381_v59 }
 0x2d1   :  { %1386 = vmatprep.subr.bf16.mxu1 %v1385_v62 }
 0x2d4   :  { %1388 = vmatpush3.bf16.msra.mxu1 %v1385_v62 }
 0x2d5   :  { %1390 = vmatprep.subr.bf16.mxu1 %v1389_v1 }
 0x2d8   :  { %1392 = vmatpush3.bf16.msra.mxu1 %v1389_v1 }
 0x2d9   :  { %1394 = vmatprep.subr.bf16.mxu1 %v1393_v6 }
 0x2dc   :  { %1396 = vmatpush3.bf16.msra.mxu1 %v1393_v6  ;;  %v773_v6 = vrot.slane %v1584_v13, 4 }
 0x392   :  { %v1216_v30 = vpop.f32.mrb[8].mxu1 }
 0x393   :  { %v396_v31 = vpop.f32.mrb[9].mxu1 }
 0x394   :  { %v405_v32 = vpack.c.bf16 %v1216_v30, %v396_v31 }
 0x396   :  { %1218 = vmatpush3.bf16.msra.mxu0 %v405_v32 }
 0x397   :  { %1223 = vmatprep.subr.bf16.mxu0 %v1478_v4 }
 0x399   :  { %1220 = vmatmul.mubr.msk.bf16.vlgmr.msra.gmra.mrb[4].mxu0 %vm154_vm2, %v1568_v10 }
 0x39a   :  { %1225 = vmatprep.mubr.msk.bf16.mxu0 %vm1479_vm1, %v1478_v4 }
 0x46c   :  { %v440_v33 = vpop.f32.mrb[4].mxu0 }
 0x46d   :  { %v446_v34 = vmul.f32 %v440_v33, %v1587_v14  ;;  %v1221_v39 = vpop.f32.mrb[5].mxu0 }
 0x46e   :  { %v443_v40 = vpop.f32.mrb[6].mxu0 }
 0x46f   :  { %v447_v41 = vpack.c.bf16 %v446_v34, %v446_v34  ;;  %v1222_v42 = vpop.f32.mrb[7].mxu0 }
 0x471   :  { %v449_v44 = vsel %vm208_vm3, %v447_v41, 0 }
 0x472   :  { %1224 = vmatpush3.bf16.msra.mxu0 %v449_v44 }
 0x473   :  { %1264 = vmatprep.subr.bf16.mxu0 %v1478_v4 }
 0x475   :  { %1226 = vmatmul.mubr.msk.bf16.vlgmr.msra.gmra.mrb[8].mxu0 %vm49_vm0, %v1555_v3 }
 0x476   :  { %1266 = vmatprep.mubr.msk.bf16.mxu0 %vm1479_vm1, %v1478_v4 }
 0x548   :  { %v485_v9 = vpop.f32.mrb[8].mxu0 }
 0x549   :  { %v492_v11 = vmul.f32 %v485_v9, %v1627_v38  ;;  %v1227_v12 = vpop.f32.mrb[9].mxu0 }
 0x54a   :  { %v488_v15 = vpop.f32.mrb[10].mxu0  ;;  %v771_v12 = vpop.permute.xlu1 %770 }
 0x54b   :  { %v498_v16 = vadd.f32 %v497_v8, %v492_v11  ;;  %v493_v17 = vmul.f32 %v488_v15, %v1632_v43  ;;  %v1228_v18 = vpop.f32.mrb[11].mxu0  ;;  %v789_v11 = vld [vmem:[%s1862_s8] sm:$0xff] }
 0x54c   :  { %v1481_v18 = vmov 0.0|0.0  }
 0x54d   :  { %v499_v19 = vadd.f32 %v497_v8, %v493_v17  ;;  %v508_v20 = vmul.f32 %v498_v16, %v498_v16  ;;  %v775_v17 = vmul.f32 %v773_v6, %v771_v12 }
 0x54f   :  { %v500_v21 = vadd.f32 %v499_v19, %v498_v16  ;;  %v509_v22 = vmul.f32 %v499_v19, %v499_v19 }
 0x551   :  { %v501_v23 = vrot.slane %v500_v21, 4  ;;  %v510_v24 = vadd.f32 %v509_v22, %v508_v20  ;;  %v792_v20 = vld [vmem:[%s1862_s8 + $0x18] sm:$0xff] }
 0x553   :  { %v502_v25 = vadd.f32 %v501_v23, %v500_v21  ;;  %v511_v26 = vrot.slane %v510_v24, 4  ;;  %v793_v23 = vld [vmem:[%s1862_s8 + $0x20] sm:$0xff] }
 0x555   :  { %v503_v27 = vrot.slane %v502_v25, 2  ;;  %v512_v28 = vadd.f32 %v511_v26, %v510_v24  ;;  %v794_v24 = vld [vmem:[%s1862_s8 + $0x28] sm:$0xff] }
 0x557   :  { %v504_v29 = vadd.f32 %v503_v27, %v502_v25  ;;  %v513_v30 = vrot.slane %v512_v28, 2  ;;  %v1404_v25 = vpack.c.bf16 %v794_v24, %v793_v23 }
 0x559   :  { %v505_v31 = vrot.slane %v504_v29, 1  ;;  %v514_v32 = vadd.f32 %v513_v30, %v512_v28  ;;  %v781_v30 = vld [vmem:[%s1863_s7] sm:$0xff] }
 0x55b   :  { %v506_v33 = vadd.f32 %v505_v31, %v504_v29  ;;  %v515_v34 = vrot.slane %v514_v32, 1  ;;  %v782_v31 = vld [vmem:[%s1863_s7 + $0x8] sm:$0xff] }
 0x55d   :  { %v507_v39 = vmul.f32 0.0625, %v506_v33  ;;  %v516_v40 = vadd.f32 %v515_v34, %v514_v32  ;;  %v1409_v32 = vpack.c.bf16 %v782_v31, %v781_v30  ;;  %v783_v33 = vld [vmem:[%s1863_s7 + $0x10] sm:$0xff]  ;;  %v784_v34 = vld [vmem:[%s1863_s7 + $0x18] sm:$0xff] }
 0x55f   :  { %v517_v41 = vmul.f32 0.0625, %v516_v40  ;;  %v518_v42 = vmul.f32 %v507_v39, %v507_v39  ;;  %v521_v44 = vsub.f32 %v499_v19, %v507_v39  ;;  %v520_v45 = vsub.f32 %v498_v16, %v507_v39  ;;  %v791_v19 = vld [vmem:[%s1862_s8 + $0x10] sm:$0xff]  ;;  %1410 = vmatprep.subr.bf16.mxu1 %v1409_v32  ;;  %v785_v40 = vld [vmem:[%s1863_s7 + $0x20] sm:$0xff] }
 0x560   :  { %v1401_v21 = vpack.c.bf16 %v792_v20, %v791_v19  ;;  %v1413_v39 = vpack.c.bf16 %v784_v34, %v783_v33 }
 0x561   :  { %v519_v46 = vsub.f32 %v517_v41, %v518_v42  ;;  %v786_v41 = vld [vmem:[%s1863_s7 + $0x28] sm:$0xff] }
 0x562   :  { %v1417_v42 = vpack.c.bf16 %v786_v41, %v785_v40 }
 0x563   :  { %v522_v47 = vadd.f32 1e-05, %v519_v46 }
 0x565   :  { %1466 = vrsqrt.f32 %v522_v47  ;;  %v964_v47 = vld [vmem:[%s1864_s9] sm:$0xff] }
 0x56f   :  { %v1467_v51 = vpop.eup %1466 }
 0x570   :  { %v525_v52 = vmul.f32 %v1467_v51, %v521_v44  ;;  %v524_v53 = vmul.f32 %v1467_v51, %v520_v45  ;;  %v787_v44 = vld [vmem:[%s1863_s7 + $0x30] sm:$0xff]  ;;  %v788_v45 = vld [vmem:[%s1863_s7 + $0x38] sm:$0xff]  ;;  %v1425_v51 = vpack.c.bf16 %v965_v49, %v964_v47 }
 0x571   :  { %v1421_v46 = vpack.c.bf16 %v788_v45, %v787_v44 }
 0x572   :  { %v530_v55 = vmul.f32 %v529_v50, %v524_v53  ;;  %v531_v56 = vmul.f32 %v529_v50, %v525_v52  ;;  %v966_v50 = vld [vmem:[%s1864_s9 + $0x10] sm:$0xff]  ;;  %v967_v52 = vld [vmem:[%s1864_s9 + $0x18] sm:$0xff] }
 0x573   :  { %v1429_v53 = vpack.c.bf16 %v967_v52, %v966_v50  ;;  %v765_v52 = vrot.slane %v1584_v13, %v1620_v36 }
 0x574   :  { %v536_v57 = vadd.f32 %v535_v54, %v530_v55  ;;  %v537_v58 = vadd.f32 %v535_v54, %v531_v56  ;;  %v968_v54 = vld [vmem:[%s1864_s9 + $0x20] sm:$0xff]  ;;  %v969_v55 = vld [vmem:[%s1864_s9 + $0x28] sm:$0xff] }
 0x575   :  { %v1433_v56 = vpack.c.bf16 %v969_v55, %v968_v54 }
 0x576   :  { %v538_v59 = vmax.f32 %v536_v57, 0.0  ;;  %v539_v60 = vmax.f32 %v537_v58, 0.0  ;;  %v970_v57 = vld [vmem:[%s1864_s9 + $0x30] sm:$0xff]  ;;  %v971_v58 = vld [vmem:[%s1864_s9 + $0x38] sm:$0xff] }
 0x578   :  { %1261 = vmatprep.mubr.f32.mxu1 %v538_v59  ;;  %v1437_v59 = vpack.c.bf16 %v971_v58, %v970_v57  ;;  %v976_v57 = vld [vmem:[%s1864_s9 + $0x60] sm:$0xff] }
 0x579   :  { %1262 = vmatmul.mubr.f32.vlgmr.msra.gmra.mrb[10].mxu1 %v539_v60  ;;  %v972_v60 = vld [vmem:[%s1864_s9 + $0x40] sm:$0xff] }
 0x57a   :  { %1412 = vmatpush3.bf16.msra.mxu1 %v1409_v32 }
 0x57b   :  { %1414 = vmatprep.subr.bf16.mxu1 %v1413_v39 }
 0x57e   :  { %1416 = vmatpush3.bf16.msra.mxu1 %v1413_v39 }
 0x57f   :  { %1418 = vmatprep.subr.bf16.mxu1 %v1417_v42 }
 0x582   :  { %1420 = vmatpush3.bf16.msra.mxu1 %v1417_v42 }
 0x583   :  { %1422 = vmatprep.subr.bf16.mxu1 %v1421_v46 }
 0x586   :  { %1424 = vmatpush3.bf16.msra.mxu1 %v1421_v46  ;;  %v758_v46 = vsub.s32 7, %v1617_v35 }
 0x588   :  { %v759_v47 = vrot.slane %v1625_v37, %v758_v46 }
 0x64c   :  { %v1263_v61 = vpop.f32.mrb[10].mxu1 }
 0x64d   :  { %v622_v62 = vpop.f32.mrb[11].mxu1 }
 0x64e   :  { %v631_v63 = vpack.c.bf16 %v1263_v61, %v622_v62  ;;  %v973_v61 = vld [vmem:[%s1864_s9 + $0x48] sm:$0xff] }
 0x64f   :  { %v1441_v62 = vpack.c.bf16 %v973_v61, %v972_v60  ;;  %v979_v60 = vld [vmem:[%s1864_s9 + $0x78] sm:$0xff] }
 0x650   :  { %1265 = vmatpush3.bf16.msra.mxu0 %v631_v63  ;;  %v974_v63 = vld [vmem:[%s1864_s9 + $0x50] sm:$0xff] }
 0x651   :  { %1270 = vmatprep.subr.bf16.mxu0 %v1478_v4 }
 0x653   :  { %1267 = vmatmul.mubr.msk.bf16.vlgmr.msra.gmra.mrb[12].mxu0 %vm154_vm2, %v1568_v10  ;;  %v790_v10 = vld [vmem:[%s1862_s8 + $0x8] sm:$0xff] }
 0x654   :  { %1272 = vmatprep.mubr.msk.bf16.mxu0 %vm1479_vm1, %v1478_v4  ;;  %v1398_v16 = vpack.c.bf16 %v790_v10, %v789_v11 }
 0x726   :  { %v666_v0 = vpop.f32.mrb[12].mxu0 }
 0x727   :  { %v672_v1 = vmul.f32 %v666_v0, %v1587_v14  ;;  %v1268_v2 = vpop.f32.mrb[13].mxu0  ;;  %v776_v14 = vrot.slane %v1584_v13, 5  ;;  %v975_v0 = vld [vmem:[%s1864_s9 + $0x58] sm:$0xff] }
 0x728   :  { %v669_v5 = vpop.f32.mrb[14].mxu0  ;;  %v722_v2 = vsub.s32 6, %v1617_v35 }
 0x729   :  { %v673_v8 = vpack.c.bf16 %v672_v1, %v672_v1  ;;  %v1269_v9 = vpop.f32.mrb[15].mxu0  ;;  %v778_v22 = vadd.f32 %v776_v14, %v775_v17  ;;  %v1445_v1 = vpack.c.bf16 %v975_v0, %v974_v63  ;;  %v959_v63 = vrot.slane %v1584_v13, %v496_v7 }
 0x72a   :  { %v723_v5 = vrot.slane %v1625_v37, %v722_v2  ;;  %v977_v37 = vld [vmem:[%s1864_s9 + $0x68] sm:$0xff] }
 0x72b   :  { %v675_v15 = vsel %vm208_vm3, %v673_v8, 0  ;;  %v779_v26 = vmax.f32 %v778_v22, 0.0  ;;  %v1449_v58 = vpack.c.bf16 %v977_v37, %v976_v57 }
 0x72c   :  { %1271 = vmatpush3.bf16.msra.mxu0 %v675_v15 }
 0x72d   :  { %1397 = vmatprep.subr.bf16.mxu0 %v1481_v18  ;;  %v780_v28 = vmul.f32 2.0, %v779_v26 }
 0x72f   :  { %1273 = vmatmul.mubr.msk.bf16.vlgmr.msra.gmra.mrb[16].mxu0 %vm49_vm0, %v1555_v3  ;;  %v795_v3 = vld [vmem:[%s1862_s8 + $0x30] sm:$0xff]  ;;  %v798_v29 = vrot.slane %v780_v28, 5 }
 0x730   :  { %1399 = vmatpush3.bf16.msra.mxu0 %v1398_v16  ;;  %1292 = vmatprep.mubr.msk.f32.mxu0 %vm1479_vm1, %v1478_v4  ;;  %v796_v4 = vld [vmem:[%s1862_s8 + $0x38] sm:$0xff] }
 0x731   :  { %1400 = vmatprep.subr.bf16.mxu0 %v1481_v18  ;;  %v1407_v27 = vpack.c.bf16 %v796_v4, %v795_v3 }
 0x734   :  { %1402 = vmatpush3.bf16.msra.mxu0 %v1401_v21 }
 0x735   :  { %1403 = vmatprep.subr.bf16.mxu0 %v1481_v18 }
 0x738   :  { %1405 = vmatpush3.bf16.msra.mxu0 %v1404_v25 }
 0x739   :  { %1406 = vmatprep.subr.bf16.mxu0 %v1481_v18 }
 0x73c   :  { %1408 = vmatpush3.bf16.msra.mxu0 %v1407_v27 }
 0x73d   :  { %1426 = vmatprep.subr.bf16.mxu0 %v1425_v51 }
 0x73f   :  { %1293 = vmatmul.mubr.msk.f32.vlgmr.msra.gmra.mrb[2].mxu0 %vm271_vm4, %v798_v29 }
 0x740   :  { %1428 = vmatpush3.bf16.msra.mxu0 %v1425_v51 }
 0x741   :  { %1430 = vmatprep.subr.bf16.mxu0 %v1429_v53 }
 0x744   :  { %1432 = vmatpush3.bf16.msra.mxu0 %v1429_v53 }
 0x745   :  { %1434 = vmatprep.subr.bf16.mxu0 %v1433_v56 }
 0x748   :  { %1436 = vmatpush3.bf16.msra.mxu0 %v1433_v56 }
 0x749   :  { %1438 = vmatprep.subr.bf16.mxu0 %v1437_v59 }
 0x74c   :  { %1440 = vmatpush3.bf16.msra.mxu0 %v1437_v59  ;;  %v978_v59 = vld [vmem:[%s1864_s9 + $0x70] sm:$0xff] }
 0x74d   :  { %1442 = vmatprep.subr.bf16.mxu0 %v1441_v62  ;;  %v1453_v61 = vpack.c.bf16 %v979_v60, %v978_v59 }
 0x750   :  { %1444 = vmatpush3.bf16.msra.mxu0 %v1441_v62 }
 0x751   :  { %1446 = vmatprep.subr.bf16.mxu0 %v1445_v1 }
 0x754   :  { %1448 = vmatpush3.bf16.msra.mxu0 %v1445_v1 }
 0x755   :  { %1450 = vmatprep.subr.bf16.mxu0 %v1449_v58 }
 0x758   :  { %1452 = vmatpush3.bf16.msra.mxu0 %v1449_v58 }
 0x759   :  { %1454 = vmatprep.subr.bf16.mxu0 %v1453_v61 }
 0x75c   :  { %1456 = vmatpush3.bf16.msra.mxu0 %v1453_v61 }
 0x802   :  { %v711_v6 = vpop.f32.mrb[16].mxu0 }
 0x803   :  { %v718_v8 = vmul.f32 %v711_v6, %v1627_v38  ;;  %v1274_v9 = vpop.f32.mrb[17].mxu0 }
 0x804   :  { %v714_v11 = vpop.f32.mrb[18].mxu0 }
 0x805   :  { %v724_v10 = vadd.f32 %v723_v5, %v718_v8  ;;  %v719_v12 = vmul.f32 %v714_v11, %v1632_v43  ;;  %v1275_v15 = vpop.f32.mrb[19].mxu0 }
 0x807   :  { %v736_v16 = vmul.f32 %v724_v10, %v724_v10  ;;  %v725_v14 = vadd.f32 %v723_v5, %v719_v12  ;;  %v726_v17 = vsel %vm271_vm4, %v724_v10, 0.0 }
 0x809   :  { %v727_v18 = vsel %vm271_vm4, %v725_v14, 0.0  ;;  %v737_v19 = vmul.f32 %v725_v14, %v725_v14  ;;  %v738_v21 = vsel %vm271_vm4, %v736_v16, 0.0 }
 0x80a   :  { %v728_v20 = vadd.f32 %v727_v18, %v726_v17 }
 0x80b   :  { %v739_v22 = vsel %vm271_vm4, %v737_v19, 0.0 }
 0x80c   :  { %v729_v23 = vrot.slane %v728_v20, 4  ;;  %v740_v38 = vadd.f32 %v739_v22, %v738_v21 }
 0x80e   :  { %v730_v24 = vadd.f32 %v729_v23, %v728_v20  ;;  %v741_v25 = vrot.slane %v740_v38, 4 }
 0x810   :  { %v731_v26 = vrot.slane %v730_v24, 2  ;;  %v742_v3 = vadd.f32 %v741_v25, %v740_v38 }
 0x812   :  { %v732_v43 = vadd.f32 %v731_v26, %v730_v24  ;;  %v743_v4 = vrot.slane %v742_v3, 2  ;;  %v867_v27 = vpop.f32.mrb[2].mxu0 }
 0x813   :  { %v1294_v28 = vpop.f32.mrb[3].mxu0  ;;  %v874_v62 = vrot.slane %v867_v27, %v1620_v36 }
 0x814   :  { %v733_v29 = vrot.slane %v732_v43, 1  ;;  %v744_v30 = vadd.f32 %v743_v4, %v742_v3 }
 0x816   :  { %v734_v31 = vadd.f32 %v733_v29, %v732_v43  ;;  %v745_v32 = vrot.slane %v744_v30, 1 }
 0x818   :  { %v735_v33 = vmul.f32 0.0625, %v734_v31  ;;  %v746_v34 = vadd.f32 %v745_v32, %v744_v30 }
 0x81a   :  { %v747_v39 = vmul.f32 0.0625, %v746_v34  ;;  %v748_v40 = vmul.f32 %v735_v33, %v735_v33  ;;  %v751_v41 = vsub.f32 %v725_v14, %v735_v33  ;;  %v750_v42 = vsub.f32 %v724_v10, %v735_v33 }
 0x81b   :  { %v983_v10 = vrot.slane %v1584_v13, %v528_v48 }
 0x81c   :  { %v749_v44 = vsub.f32 %v747_v39, %v748_v40 }
 0x81e   :  { %v752_v45 = vadd.f32 1e-05, %v749_v44 }
 0x820   :  { %1468 = vrsqrt.f32 %v752_v45 }
 0x82a   :  { %v1469_v49 = vpop.eup %1468 }
 0x82b   :  { %v755_v50 = vmul.f32 %v1469_v49, %v751_v41  ;;  %v754_v51 = vmul.f32 %v1469_v49, %v750_v42 }
 0x82d   :  { %v761_v53 = vmul.f32 %v759_v47, %v755_v50  ;;  %v760_v54 = vmul.f32 %v759_v47, %v754_v51 }
 0x82f   :  { %v766_v55 = vadd.f32 %v765_v52, %v760_v54  ;;  %v767_v56 = vadd.f32 %v765_v52, %v761_v53 }
 0x831   :  { %1311 = vmatprep.mubr.msk.f32.mxu1 %vm271_vm4, %v766_v55 }
 0x832   :  { %1312 = vmatmul.mubr.msk.f32.vlgmr.msra.gmra.mrb[12].mxu1 %vm271_vm4, %v767_v56 }
 0x905   :  { %v1313_v0 = vpop.f32.mrb[12].mxu1 }
 0x906   :  { %v953_v1 = vadd.f32 %v1313_v0, %v874_v62  ;;  %v947_v2 = vpop.f32.mrb[13].mxu1 }
 0x907   :  { %v948_v5 = vadd.f32 %v947_v2, %v874_v62 }
 0x908   :  { %v961_v6 = vadd.f32 %v959_v63, %v953_v1 }
 0x909   :  { %v960_v8 = vadd.f32 %v959_v63, %v948_v5 }
 0x90a   :  { %v963_v11 = vmax.f32 %v961_v6, 0.0 }
 0x90b   :  { %v962_v9 = vmax.f32 %v960_v8, 0.0 }
 0x90d   :  { %1346 = vmatprep.mubr.f32.mxu0 %v962_v9 }
 0x90e   :  { %1347 = vmatmul.mubr.f32.vlgmr.msra.gmra.mrb[20].mxu0 %v963_v11 }
 0x9e1   :  { %v1348_v12 = vpop.f32.mrb[20].mxu0 }
 0x9e2   :  { %v1056_v36 = vadd.f32 %v1348_v12, %v983_v10  ;;  %v1050_v15 = vpop.f32.mrb[21].mxu0 }
 0x9e3   :  { %v1051_v16 = vadd.f32 %v1050_v15, %v983_v10 }
 0x9e4   :  { %1061 = vmax.xlane.f32.xlu0 %v1056_v36 }
 0x9e5   :  { %1059 = vmax.xlane.f32.xlu1 %v1051_v16 }
 0xa71   :  { %v1062_v7 = vpop.xlane.xlu0 %1061 }
 0xa72   :  { %v1060_v14 = vpop.xlane.xlu1 %1059  ;;  %v1064_v17 = vsub.f32 %v1056_v36, %v1062_v7 }
 0xa73   :  { %v1063_v18 = vsub.f32 %v1051_v16, %v1060_v14 }
 0xa74   :  { %v1067_v20 = vmul.f32 1.442695, %v1064_v17 }
 0xa75   :  { %v1065_v19 = vmul.f32 1.442695, %v1063_v18 }
 0xa77   :  { %1470 = vpow2.f32 %v1065_v19 }
 0xa78   :  { %1472 = vpow2.f32 %v1067_v20 }
 0xa81   :  { %v1471_v21 = vpop.eup %1470 }
 0xa82   :  { %1069 = vadd.xlane.f32.xlu0 %v1471_v21  ;;  %v1473_v22 = vpop.eup %1472 }
 0xa86   :  { %1071 = vadd.xlane.f32.xlu0 %v1473_v22 }
 0xb0f   :  { %v1070_v35 = vpop.xlane.xlu0 %1069 }
 0xb10   :  { %1474 = vlog2.f32 %v1070_v35 }
 0xb13   :  { %v1072_v13 = vpop.xlane.xlu0 %1071 }
 0xb14   :  { %1476 = vlog2.f32 %v1072_v13 }
 0xb1a   :  { %v1475_v48 = vpop.eup %1474 }
 0xb1b   :  { %v1074_v23 = vmul.f32 0.6931472, %v1475_v48 }
 0xb1d   :  { %v1077_v38 = vadd.f32 %v1074_v23, %v1060_v14 }
 0xb1e   :  { %v1477_v24 = vpop.eup %1476 }
 0xb1f   :  { %v1079_v25 = vsub.f32 %v1051_v16, %v1077_v38  ;;  %v1076_v26 = vmul.f32 0.6931472, %v1477_v24 }
 0xb21   :  { %1081 = vst [vmem:[%s1865_s11] sm:$0xff] %v1079_v25  ;;  %v1078_v3 = vadd.f32 %v1076_v26, %v1062_v7 }
 0xb23   :  { %v1080_v43 = vsub.f32 %v1056_v36, %v1078_v3 }
 0xb25   :  { %1082 = vst [vmem:[%s1865_s11 + $0x8] sm:$0xff] %v1080_v43 }

</bundles_post_ra>
